<compile_context>
chip_gen: v7x
topology: tpu7x:2x2x1
jax: 0.10.0
libtpu: 0.0.40
codegen_flags: <defaults>
</compile_context>

<pallas_src>
import functools
import math

import jax
import jax.numpy as jnp
from jax.experimental import pallas as pl
from jax.experimental.pallas import tpu as pltpu  # noqa: F401  (CompilerParams when scaling, see notes)


# ---------------- Pallas kernel: fully fused MLP (all layers in one body) ----------------
def _fused_mlp_kernel(*refs, n_layers: int):
    """refs = (x_ref, w1_ref, b1_ref, ..., wn_ref, bn_ref, o_ref).

    Every tile is a full-array VMEM block; intermediates are kept as f32 values (a few vregs),
    so activations never touch HBM between layers. Matmul operands are bf16 (MXU-native),
    accumulation is f32 on the MXU; bias add / ReLU stay f32 on the VPU.
    """
    x_ref = refs[0]
    o_ref = refs[-1]
    p_refs = refs[1:-1]

    h = x_ref[...]                                       # f32 activations
    for i in range(n_layers):
        w = p_refs[2 * i][...]                           # bf16 weights [K, N]
        b = p_refs[2 * i + 1][...]                       # f32 bias (1, N) -> broadcasts over rows
        h = jnp.dot(h.astype(w.dtype), w,                # bf16 x bf16 operands, f32 accumulate
                    preferred_element_type=jnp.float32) + b
        if i < n_layers - 1:                             # hidden layers: ReLU; last: identity
            h = jnp.maximum(h, 0.0)
    o_ref[...] = h.astype(o_ref.dtype)


def mlp_forward(x, params, output_dim):
    """x: [B, ...] -> flattened to [B, -1]; all but last layer use ReLU; last is plain Linear.

    One gridless pallas_call for the whole stack (every operand is a single full-array block,
    which satisfies the (8,128) constraint via the full-array-dims escape). The batch dim is
    padded to a multiple of 8 (sublane granule) and the final layer's lane dim was padded to a
    multiple of 128 at init; both paddings are sliced off here on the host.
    """
    B = x.shape[0]
    h = x.reshape(B, -1).astype(jnp.float32)

    B_pad = ((B + 7) // 8) * 8                           # full sublanes -> unmasked vreg I/O
    if B_pad != B:
        h = jnp.pad(h, ((0, B_pad - B), (0, 0)))

    flat_params = []
    in_specs = [pl.BlockSpec(h.shape, lambda: (0, 0))]
    for w, b in params:
        flat_params += [w, b]
        in_specs += [
            pl.BlockSpec(w.shape, lambda: (0, 0)),
            pl.BlockSpec(b.shape, lambda: (0, 0)),
        ]
    n_out_pad = params[-1][0].shape[1]                   # lane-padded output width (mult of 128)

    kernel = functools.partial(_fused_mlp_kernel, n_layers=len(params))
    out = pl.pallas_call(
        kernel,
        out_shape=jax.ShapeDtypeStruct((B_pad, n_out_pad), jnp.float32),
        in_specs=in_specs,
        out_specs=pl.BlockSpec((B_pad, n_out_pad), lambda: (0, 0)),
    )(h, *flat_params)
    return out[:B, :output_dim]


# ---------------- Parameter init (deterministic, PyTorch nn.Linear default) ----------------
def init_linear_params(key, in_dim, out_dim, pad_out=None, w_dtype=jnp.bfloat16):
    """nn.Linear default init: kaiming_uniform_(a=sqrt(5)) -> bound = 1/sqrt(fan_in) for both
    weight and bias. Weight stored bf16 (MXU operand), bias stays f32 and pre-shaped (1, N).
    `pad_out` appends zero output columns (lane-dense final store; sliced off on host)."""
    kw, kb = jax.random.split(key)
    bound = 1.0 / math.sqrt(in_dim)
    w = jax.random.uniform(kw, (in_dim, out_dim), jnp.float32, -bound, bound)
    b = jax.random.uniform(kb, (1, out_dim), jnp.float32, -bound, bound)
    if pad_out is not None and pad_out > out_dim:
        w = jnp.pad(w, ((0, 0), (0, pad_out - out_dim)))
        b = jnp.pad(b, ((0, 0), (0, pad_out - out_dim)))
    return w.astype(w_dtype), b


def init_mlp_params(key, input_dim, output_dim, dim, n_blk):
    dims = [input_dim] + [dim] * (n_blk - 1) + [output_dim]
    keys = jax.random.split(key, len(dims) - 1)
    params = []
    for li, (k, di, do) in enumerate(zip(keys, dims[:-1], dims[1:])):
        is_last = li == len(dims) - 2
        pad_out = ((do + 127) // 128) * 128 if is_last else None
        params.append(init_linear_params(k, di, do, pad_out=pad_out))
    return params


if __name__ == "__main__":
    # MLP(input_dim=4*16*16, output_dim=8, dim=32, n_blk=3, norm='none', activ='relu')
    B, C, H, W = 2, 4, 16, 16
    input_dim = C * H * W
    output_dim = 8
    dim = 32
    n_blk = 3

    key = jax.random.PRNGKey(0)
    kx, kp = jax.random.split(key)
    x = jax.random.normal(kx, (B, C, H, W), jnp.float32)
    params = init_mlp_params(kp, input_dim, output_dim, dim, n_blk)

    fwd = jax.jit(mlp_forward, static_argnames=("output_dim",))
    out = fwd(x, params, output_dim=output_dim)
    out = jax.block_until_ready(out)

    # sanity check against a plain-JAX reference (same bf16 quantization points as the kernel,
    # f32 math pinned to HIGHEST precision to avoid the default-precision MXU caveat)
    h_ref = x.reshape(B, -1)
    for i, (w, b) in enumerate(params):
        h_ref = jnp.dot(h_ref.astype(jnp.bfloat16).astype(jnp.float32),
                        w.astype(jnp.float32),
                        precision=jax.lax.Precision.HIGHEST) + b
        if i < len(params) - 1:
            h_ref = jnp.maximum(h_ref, 0.0)
    h_ref = h_ref[:, :output_dim]

    assert out.shape == (B, output_dim)
    assert jnp.allclose(out, h_ref, atol=1e-4, rtol=1e-4), \
        float(jnp.max(jnp.abs(out - h_ref)))

    print("KERNEL_OK")
</pallas_src>

<mosaic_0001>
module attributes {stable_mosaic.version = 11 : i64} {
  func.func @_fused_mlp_kernel(%arg0: memref<8x1024xf32, #tpu.memory_space<vmem>>, %arg1: memref<1024x32xbf16, #tpu.memory_space<vmem>>, %arg2: memref<1x32xf32, #tpu.memory_space<vmem>>, %arg3: memref<32x32xbf16, #tpu.memory_space<vmem>>, %arg4: memref<1x32xf32, #tpu.memory_space<vmem>>, %arg5: memref<32x128xbf16, #tpu.memory_space<vmem>>, %arg6: memref<1x128xf32, #tpu.memory_space<vmem>>, %arg7: memref<8x128xf32, #tpu.memory_space<vmem>>) attributes {dimension_semantics = [], scalar_prefetch = 0 : i64, scratch_operands = 0 : i64, tpu.core_type = #tpu.core_type<tc>} {
    %c0 = arith.constant 0 : index
    %c0_0 = arith.constant 0 : index
    %0 = vector.load %arg0[%c0, %c0_0] : memref<8x1024xf32, #tpu.memory_space<vmem>>, vector<8x1024xf32>
    %c0_1 = arith.constant 0 : index
    %c0_2 = arith.constant 0 : index
    %1 = vector.load %arg1[%c0_1, %c0_2] : memref<1024x32xbf16, #tpu.memory_space<vmem>>, vector<1024x32xbf16>
    %c0_3 = arith.constant 0 : index
    %c0_4 = arith.constant 0 : index
    %2 = vector.load %arg2[%c0_3, %c0_4] : memref<1x32xf32, #tpu.memory_space<vmem>>, vector<1x32xf32>
    %3 = arith.truncf %0 : vector<8x1024xf32> to vector<8x1024xbf16>
    %cst = arith.constant dense<0.000000e+00> : vector<8x32xf32>
    %4 = tpu.matmul %3, %1, %cst {dimension_numbers = #tpu.dot_dimension_numbers<[1], [0], [0], [1], [0, 0, 1, 1], [], []>} : vector<8x1024xbf16>, vector<1024x32xbf16>, vector<8x32xf32> -> vector<8x32xf32>
    %5 = vector.broadcast %2 : vector<1x32xf32> to vector<8x32xf32>
    %6 = arith.addf %4, %5 : vector<8x32xf32>
    %cst_5 = arith.constant 0.000000e+00 : f32
    %7 = vector.broadcast %cst_5 : f32 to vector<8x32xf32>
    %8 = arith.maximumf %6, %7 : vector<8x32xf32>
    %c0_6 = arith.constant 0 : index
    %c0_7 = arith.constant 0 : index
    %9 = vector.load %arg3[%c0_6, %c0_7] : memref<32x32xbf16, #tpu.memory_space<vmem>>, vector<32x32xbf16>
    %c0_8 = arith.constant 0 : index
    %c0_9 = arith.constant 0 : index
    %10 = vector.load %arg4[%c0_8, %c0_9] : memref<1x32xf32, #tpu.memory_space<vmem>>, vector<1x32xf32>
    %11 = arith.truncf %8 : vector<8x32xf32> to vector<8x32xbf16>
    %cst_10 = arith.constant dense<0.000000e+00> : vector<8x32xf32>
    %12 = tpu.matmul %11, %9, %cst_10 {dimension_numbers = #tpu.dot_dimension_numbers<[1], [0], [0], [1], [0, 0, 1, 1], [], []>} : vector<8x32xbf16>, vector<32x32xbf16>, vector<8x32xf32> -> vector<8x32xf32>
    %13 = vector.broadcast %10 : vector<1x32xf32> to vector<8x32xf32>
    %14 = arith.addf %12, %13 : vector<8x32xf32>
    %cst_11 = arith.constant 0.000000e+00 : f32
    %15 = vector.broadcast %cst_11 : f32 to vector<8x32xf32>
    %16 = arith.maximumf %14, %15 : vector<8x32xf32>
    %c0_12 = arith.constant 0 : index
    %c0_13 = arith.constant 0 : index
    %17 = vector.load %arg5[%c0_12, %c0_13] : memref<32x128xbf16, #tpu.memory_space<vmem>>, vector<32x128xbf16>
    %c0_14 = arith.constant 0 : index
    %c0_15 = arith.constant 0 : index
    %18 = vector.load %arg6[%c0_14, %c0_15] : memref<1x128xf32, #tpu.memory_space<vmem>>, vector<1x128xf32>
    %19 = arith.truncf %16 : vector<8x32xf32> to vector<8x32xbf16>
    %cst_16 = arith.constant dense<0.000000e+00> : vector<8x128xf32>
    %20 = tpu.matmul %19, %17, %cst_16 {dimension_numbers = #tpu.dot_dimension_numbers<[1], [0], [0], [1], [0, 0, 1, 1], [], []>} : vector<8x32xbf16>, vector<32x128xbf16>, vector<8x128xf32> -> vector<8x128xf32>
    %21 = vector.broadcast %18 : vector<1x128xf32> to vector<8x128xf32>
    %22 = arith.addf %20, %21 : vector<8x128xf32>
    %c0_17 = arith.constant 0 : index
    %c0_18 = arith.constant 0 : index
    %23 = vector.load %arg7[%c0_17, %c0_18] : memref<8x128xf32, #tpu.memory_space<vmem>>, vector<8x128xf32>
    tpu.vector_store %arg7[%c0_17, %c0_18], %22 {strides = array<i32>} : memref<8x128xf32, #tpu.memory_space<vmem>>, vector<8x128xf32>,
    return
  }
}

</mosaic_0001>

<bundles_post_ra>
// kernel: mlp_forward.1
= control target key start
LH: loop header
LB: loop body
LE: loop exit
PB: predicated region body
PF: predicated region fallthrough
CT: control target
= control target key end

     0   :  { %vm1118_vm0 = vmmov 0   ;;  %vm747_vm1 = vcmask 261120   ;;  %s1399_s1 = inlined_call_operand.vmem [shape: bf16[1024,32], index: 1, kind: input, shape index: {}]   ;;  %s1400_s0 = inlined_call_operand.vmem [shape: f32[8,1024], index: 0, kind: input, shape index: {}]   ;;  %s1401_s3 = inlined_call_operand.vmem [shape: bf16[32,32], index: 3, kind: input, shape index: {}]   ;;  %s1402_s5 = inlined_call_operand.vmem [shape: bf16[32,128], index: 5, kind: input, shape index: {}]   ;;  %s1403_s2 = inlined_call_operand.vmem [shape: f32[1,32], index: 2, kind: input, shape index: {}]   ;;  %s1404_s4 = inlined_call_operand.vmem [shape: f32[1,32], index: 4, kind: input, shape index: {}]   ;;  %s1405_s6 = inlined_call_operand.vmem [shape: f32[1,128], index: 6, kind: input, shape index: {}]   ;;  %s1406_s7 = inlined_call_operand.vmem [shape: f32[8,128], index: 7, kind: output, shape index: {}]  }
   0x1   :  { %v1049_v0 = vld [vmem:[%s1399_s1 + $0x40] sm:$0xff]   ;;  %v1053_v4 = vld [vmem:[%s1399_s1 + $0x48] sm:$0xff]   ;;  %v1057_v8 = vld [vmem:[%s1399_s1 + $0x50] sm:$0xff]  }
   0x2   :  { %v1050_v1 = vld [vmem:[%s1399_s1 + $0xc0] sm:$0xff]   ;;  %937 = vmatprep.subr.bf16.mxu0 %v1049_v0  ;;  %v1054_v5 = vld [vmem:[%s1399_s1 + $0xc8] sm:$0xff]   ;;  %v1058_v9 = vld [vmem:[%s1399_s1 + $0xd0] sm:$0xff]  }
   0x3   :  { %v1051_v2 = vld [vmem:[%s1399_s1] sm:$0xff]   ;;  %959 = vmatprep.subr.bf16.mxu1 %v1050_v1  ;;  %v1055_v6 = vld [vmem:[%s1399_s1 + $0x8] sm:$0xff]   ;;  %v1059_v10 = vld [vmem:[%s1399_s1 + $0x10] sm:$0xff]  }
   0x4   :  { %v1052_v3 = vld [vmem:[%s1399_s1 + $0x80] sm:$0xff]   ;;  %938 = vmatpush3.bf16.msra.mxu0 %v1051_v2  ;;  %v1056_v7 = vld [vmem:[%s1399_s1 + $0x88] sm:$0xff]   ;;  %v1060_v11 = vld [vmem:[%s1399_s1 + $0x90] sm:$0xff]  }
   0x5   :  { %960 = vmatpush3.bf16.msra.mxu1 %v1052_v3  ;;  %939 = vmatprep.subr.bf16.mxu0 %v1053_v4  ;;  %v1061_v12 = vld [vmem:[%s1399_s1 + $0x58] sm:$0xff]   ;;  %v1065_v16 = vld [vmem:[%s1399_s1 + $0x60] sm:$0xff]   ;;  %v1069_v20 = vld [vmem:[%s1399_s1 + $0x68] sm:$0xff]  }
   0x6   :  { %961 = vmatprep.subr.bf16.mxu1 %v1054_v5  ;;  %v1062_v13 = vld [vmem:[%s1399_s1 + $0xd8] sm:$0xff]   ;;  %v1066_v17 = vld [vmem:[%s1399_s1 + $0xe0] sm:$0xff]   ;;  %v1070_v21 = vld [vmem:[%s1399_s1 + $0xe8] sm:$0xff]  }
   0x7   :  { %v1063_v14 = vld [vmem:[%s1399_s1 + $0x18] sm:$0xff]   ;;  %v1067_v18 = vld [vmem:[%s1399_s1 + $0x20] sm:$0xff]   ;;  %v1071_v22 = vld [vmem:[%s1399_s1 + $0x28] sm:$0xff]  }
   0x8   :  { %940 = vmatpush3.bf16.msra.mxu0 %v1055_v6  ;;  %v1064_v15 = vld [vmem:[%s1399_s1 + $0x98] sm:$0xff]   ;;  %v1068_v19 = vld [vmem:[%s1399_s1 + $0xa0] sm:$0xff]   ;;  %v1072_v23 = vld [vmem:[%s1399_s1 + $0xa8] sm:$0xff]  }
   0x9   :  { %962 = vmatpush3.bf16.msra.mxu1 %v1056_v7  ;;  %941 = vmatprep.subr.bf16.mxu0 %v1057_v8  ;;  %v1073_v24 = vld [vmem:[%s1399_s1 + $0x70] sm:$0xff]   ;;  %v1077_v28 = vld [vmem:[%s1399_s1 + $0x78] sm:$0xff]   ;;  %v28_v32 = vld [vmem:[%s1400_s0 + $0x8] sm:$0xff] }
   0xa   :  { %963 = vmatprep.subr.bf16.mxu1 %v1058_v9  ;;  %v1074_v25 = vld [vmem:[%s1399_s1 + $0xf0] sm:$0xff]   ;;  %v1078_v29 = vld [vmem:[%s1399_s1 + $0xf8] sm:$0xff]   ;;  %v27_v34 = vld [vmem:[%s1400_s0] sm:$0xff]  ;;  %v165_v35 = vpack.c.bf16 %v28_v32, %v28_v32 }
   0xb   :  { %v1075_v26 = vld [vmem:[%s1399_s1 + $0x30] sm:$0xff]   ;;  %v1079_v30 = vld [vmem:[%s1399_s1 + $0x38] sm:$0xff]   ;;  %v164_v37 = vpack.c.bf16 %v27_v34, %v27_v34  ;;  %v1081_v40 = vld [vmem:[%s1399_s1 + $0x140] sm:$0xff]  }
   0xc   :  { %942 = vmatpush3.bf16.msra.mxu0 %v1059_v10  ;;  %v1076_v27 = vld [vmem:[%s1399_s1 + $0xb0] sm:$0xff]   ;;  %v1080_v31 = vld [vmem:[%s1399_s1 + $0xb8] sm:$0xff]   ;;  %594 = vmatprep.mubr.bf16.mxu0 %v165_v35  ;;  %v1082_v41 = vld [vmem:[%s1399_s1 + $0x1c0] sm:$0xff]  }
   0xd   :  { %964 = vmatpush3.bf16.msra.mxu1 %v1060_v11  ;;  %943 = vmatprep.subr.bf16.mxu0 %v1061_v12  ;;  %v30_v33 = vld [vmem:[%s1400_s0 + $0x18] sm:$0xff]  ;;  %v29_v38 = vld [vmem:[%s1400_s0 + $0x10] sm:$0xff]  ;;  %v1083_v42 = vld [vmem:[%s1399_s1 + $0x100] sm:$0xff]  }
   0xe   :  { %965 = vmatprep.subr.bf16.mxu1 %v1062_v13  ;;  %v167_v36 = vpack.c.bf16 %v30_v33, %v30_v33  ;;  %v166_v39 = vpack.c.bf16 %v29_v38, %v29_v38  ;;  %v1084_v43 = vld [vmem:[%s1399_s1 + $0x180] sm:$0xff]   ;;  %v1085_v44 = vld [vmem:[%s1399_s1 + $0x148] sm:$0xff]   ;;  %v1089_v48 = vld [vmem:[%s1399_s1 + $0x150] sm:$0xff]  }
   0xf   :  { %v1086_v45 = vld [vmem:[%s1399_s1 + $0x1c8] sm:$0xff]   ;;  %v1090_v49 = vld [vmem:[%s1399_s1 + $0x1d0] sm:$0xff]   ;;  %v1093_v52 = vld [vmem:[%s1399_s1 + $0x158] sm:$0xff]  }
  0x10   :  { %944 = vmatpush3.bf16.msra.mxu0 %v1063_v14  ;;  %634 = vmatprep.mubr.bf16.mxu1 %v167_v36  ;;  %v1087_v46 = vld [vmem:[%s1399_s1 + $0x108] sm:$0xff]   ;;  %v1091_v50 = vld [vmem:[%s1399_s1 + $0x110] sm:$0xff]   ;;  %v1094_v53 = vld [vmem:[%s1399_s1 + $0x1d8] sm:$0xff]  }
  0x11   :  { %966 = vmatpush3.bf16.msra.mxu1 %v1064_v15  ;;  %945 = vmatprep.subr.bf16.mxu0 %v1065_v16  ;;  %v1088_v47 = vld [vmem:[%s1399_s1 + $0x188] sm:$0xff]   ;;  %v1092_v51 = vld [vmem:[%s1399_s1 + $0x190] sm:$0xff]   ;;  %v1095_v54 = vld [vmem:[%s1399_s1 + $0x118] sm:$0xff]  }
  0x12   :  { %967 = vmatprep.subr.bf16.mxu1 %v1066_v17  ;;  %v1096_v55 = vld [vmem:[%s1399_s1 + $0x198] sm:$0xff]   ;;  %v1097_v56 = vld [vmem:[%s1399_s1 + $0x160] sm:$0xff]   ;;  %v1101_v60 = vld [vmem:[%s1399_s1 + $0x168] sm:$0xff]   ;;  %v1117_v17 = vmov 0.0  }
  0x13   :  { %v1098_v57 = vld [vmem:[%s1399_s1 + $0x1e0] sm:$0xff]   ;;  %v1102_v61 = vld [vmem:[%s1399_s1 + $0x1e8] sm:$0xff]   ;;  %v1105_v0 = vld [vmem:[%s1399_s1 + $0x170] sm:$0xff]  }
  0x14   :  { %946 = vmatpush3.bf16.msra.mxu0 %v1067_v18  ;;  %v1099_v58 = vld [vmem:[%s1399_s1 + $0x120] sm:$0xff]   ;;  %v1103_v62 = vld [vmem:[%s1399_s1 + $0x128] sm:$0xff]   ;;  %v1106_v1 = vld [vmem:[%s1399_s1 + $0x1f0] sm:$0xff]  }
  0x15   :  { %968 = vmatpush3.bf16.msra.mxu1 %v1068_v19  ;;  %947 = vmatprep.subr.bf16.mxu0 %v1069_v20  ;;  %v1100_v59 = vld [vmem:[%s1399_s1 + $0x1a0] sm:$0xff]   ;;  %v1104_v63 = vld [vmem:[%s1399_s1 + $0x1a8] sm:$0xff]   ;;  %v1107_v2 = vld [vmem:[%s1399_s1 + $0x130] sm:$0xff]  }
  0x16   :  { %969 = vmatprep.subr.bf16.mxu1 %v1070_v21  ;;  %v1108_v3 = vld [vmem:[%s1399_s1 + $0x1b0] sm:$0xff]   ;;  %v1109_v4 = vld [vmem:[%s1399_s1 + $0x178] sm:$0xff]   ;;  %v32_v8 = vld [vmem:[%s1400_s0 + $0x28] sm:$0xff] }
  0x17   :  { %v1110_v5 = vld [vmem:[%s1399_s1 + $0x1f8] sm:$0xff]   ;;  %v169_v10 = vpack.c.bf16 %v32_v8, %v32_v8  ;;  %v31_v12 = vld [vmem:[%s1400_s0 + $0x20] sm:$0xff]  ;;  %v33_v13 = vld [vmem:[%s1400_s0 + $0x30] sm:$0xff] }
  0x18   :  { %948 = vmatpush3.bf16.msra.mxu0 %v1071_v22  ;;  %v1111_v6 = vld [vmem:[%s1399_s1 + $0x138] sm:$0xff]   ;;  %v168_v14 = vpack.c.bf16 %v31_v12, %v31_v12  ;;  %v170_v15 = vpack.c.bf16 %v33_v13, %v33_v13  ;;  %v1113_v16 = vld [vmem:[%s1401_s3] sm:$0xff]   ;;  %v1114_v18 = vld [vmem:[%s1401_s3 + $0x8] sm:$0xff]  }
  0x19   :  { %970 = vmatpush3.bf16.msra.mxu1 %v1072_v23  ;;  %949 = vmatprep.subr.bf16.mxu0 %v1073_v24  ;;  %v1112_v7 = vld [vmem:[%s1399_s1 + $0x1b8] sm:$0xff]   ;;  %v1115_v19 = vld [vmem:[%s1402_s5] sm:$0xff]  }
  0x1a   :  { %971 = vmatprep.subr.bf16.mxu1 %v1074_v25  ;;  %v34_v9 = vld [vmem:[%s1400_s0 + $0x38] sm:$0xff]  ;;  %v864_v22 = vld [vmem:[%s1403_s2] ss:$0 sm:$0xff] }
  0x1b   :  { %v171_v11 = vpack.c.bf16 %v34_v9, %v34_v9 }
  0x1c   :  { %950 = vmatpush3.bf16.msra.mxu0 %v1075_v26 }
  0x1d   :  { %972 = vmatpush3.bf16.msra.mxu1 %v1076_v27  ;;  %951 = vmatprep.subr.bf16.mxu0 %v1077_v28 }
  0x1e   :  { %973 = vmatprep.subr.bf16.mxu1 %v1078_v29 }
  0x20   :  { %952 = vmatpush3.bf16.msra.mxu0 %v1079_v30 }
  0x21   :  { %974 = vmatpush3.bf16.msra.mxu1 %v1080_v31  ;;  %981 = vmatprep.subr.bf16.mxu0 %v1081_v40 }
  0x22   :  { %1003 = vmatprep.subr.bf16.mxu1 %v1082_v41 }
  0x23   :  { %595 = vmatmul.mubr.bf16.vlgmr.msra.gmra.mrb[0].mxu0 %v164_v37 }
  0x24   :  { %635 = vmatmul.mubr.bf16.vlgmr.msra.gmra.mrb[0].mxu1 %v166_v39  ;;  %982 = vmatpush3.bf16.msra.mxu0 %v1083_v42 }
  0x25   :  { %1004 = vmatpush3.bf16.msra.mxu1 %v1084_v43  ;;  %983 = vmatprep.subr.bf16.mxu0 %v1085_v44 }
  0x26   :  { %1005 = vmatprep.subr.bf16.mxu1 %v1086_v45  ;;  %674 = vmatprep.mubr.bf16.mxu0 %v169_v10 }
  0x27   :  { %714 = vmatprep.mubr.bf16.mxu1 %v171_v11 }
  0x28   :  { %984 = vmatpush3.bf16.msra.mxu0 %v1087_v46 }
  0x29   :  { %1006 = vmatpush3.bf16.msra.mxu1 %v1088_v47  ;;  %985 = vmatprep.subr.bf16.mxu0 %v1089_v48  ;;  %v1116_v47 = vld [vmem:[%s1402_s5 + $0x8] sm:$0xff]   ;;  %v929_v48 = vld [vmem:[%s1404_s4] ss:$0 sm:$0xff] }
  0x2a   :  { %1007 = vmatprep.subr.bf16.mxu1 %v1090_v49 }
  0x2c   :  { %986 = vmatpush3.bf16.msra.mxu0 %v1091_v50 }
  0x2d   :  { %1008 = vmatpush3.bf16.msra.mxu1 %v1092_v51  ;;  %987 = vmatprep.subr.bf16.mxu0 %v1093_v52 }
  0x2e   :  { %1009 = vmatprep.subr.bf16.mxu1 %v1094_v53 }
  0x30   :  { %988 = vmatpush3.bf16.msra.mxu0 %v1095_v54 }
  0x31   :  { %1010 = vmatpush3.bf16.msra.mxu1 %v1096_v55  ;;  %989 = vmatprep.subr.bf16.mxu0 %v1097_v56  ;;  %v933_v56 = vld [vmem:[%s1405_s6] ss:$0 sm:$0xff] }
  0x32   :  { %1011 = vmatprep.subr.bf16.mxu1 %v1098_v57 }
  0x34   :  { %990 = vmatpush3.bf16.msra.mxu0 %v1099_v58 }
  0x35   :  { %1012 = vmatpush3.bf16.msra.mxu1 %v1100_v59  ;;  %991 = vmatprep.subr.bf16.mxu0 %v1101_v60 }
  0x36   :  { %1013 = vmatprep.subr.bf16.mxu1 %v1102_v61 }
  0x38   :  { %992 = vmatpush3.bf16.msra.mxu0 %v1103_v62 }
  0x39   :  { %1014 = vmatpush3.bf16.msra.mxu1 %v1104_v63  ;;  %993 = vmatprep.subr.bf16.mxu0 %v1105_v0 }
  0x3a   :  { %1015 = vmatprep.subr.bf16.mxu1 %v1106_v1 }
  0x3c   :  { %994 = vmatpush3.bf16.msra.mxu0 %v1107_v2 }
  0x3d   :  { %1016 = vmatpush3.bf16.msra.mxu1 %v1108_v3  ;;  %995 = vmatprep.subr.bf16.mxu0 %v1109_v4 }
  0x3e   :  { %1017 = vmatprep.subr.bf16.mxu1 %v1110_v5 }
  0x40   :  { %996 = vmatpush3.bf16.msra.mxu0 %v1111_v6 }
  0x41   :  { %1018 = vmatpush3.bf16.msra.mxu1 %v1112_v7  ;;  %1031 = vmatprep.subr.bf16.mxu0 %v1117_v17 }
  0x42   :  { %1039 = vmatprep.subr.bf16.mxu1 %v1117_v17 }
  0x43   :  { %675 = vmatmul.mubr.bf16.vlgmr.msra.gmra.mrb[4].mxu0 %v168_v14 }
  0x44   :  { %715 = vmatmul.mubr.bf16.vlgmr.msra.gmra.mrb[4].mxu1 %v170_v15  ;;  %1032 = vmatpush3.bf16.msra.mxu0 %v1113_v16 }
  0x45   :  { %1033 = vmatprep.subr.bf16.mxu0 %v1117_v17  ;;  %1035 = vmatprep.mubr.msk.bf16.mxu0 %vm1118_vm0, %v1117_v17 }
  0x46   :  { %1043 = vmatprep.mubr.msk.bf16.mxu1 %vm1118_vm0, %v1117_v17  ;;  %1040 = vmatpush3.bf16.msra.mxu1 %v1115_v19 }
  0x47   :  { %1041 = vmatprep.subr.bf16.mxu1 %v1117_v17 }
  0x48   :  { %1034 = vmatpush3.bf16.msra.mxu0 %v1114_v18 }
  0x4a   :  { %1042 = vmatpush3.bf16.msra.mxu1 %v1116_v47 }
  0xf6   :  { %v953_v20 = vpop.f32.mrb[0].mxu0 }
  0xf7   :  { %v975_v21 = vpop.f32.mrb[0].mxu1  ;;  %v954_v23 = vpop.f32.mrb[1].mxu0 }
  0xf8   :  { %v976_v24 = vpop.f32.mrb[1].mxu1  ;;  %v955_v25 = vadd.f32 %v954_v23, %v953_v20  ;;  %v956_v27 = vpop.f32.mrb[2].mxu0 }
  0xf9   :  { %v977_v26 = vadd.f32 %v976_v24, %v975_v21  ;;  %v978_v28 = vpop.f32.mrb[2].mxu1  ;;  %v957_v29 = vpop.f32.mrb[3].mxu0 }
  0xfa   :  { %v979_v30 = vpop.f32.mrb[3].mxu1  ;;  %v597_v31 = vadd.f32 %v955_v25, %v864_v22 }
  0xfc   :  { %v637_v32 = vadd.f32 %v977_v26, %v597_v31 }
 0x116   :  { %v997_v33 = vpop.f32.mrb[4].mxu0 }
 0x117   :  { %v1019_v34 = vpop.f32.mrb[4].mxu1  ;;  %v998_v35 = vpop.f32.mrb[5].mxu0 }
 0x118   :  { %v999_v36 = vadd.f32 %v998_v35, %v997_v33  ;;  %v1020_v37 = vpop.f32.mrb[5].mxu1  ;;  %v1000_v38 = vpop.f32.mrb[6].mxu0 }
 0x119   :  { %v1021_v39 = vadd.f32 %v1020_v37, %v1019_v34  ;;  %v1022_v40 = vpop.f32.mrb[6].mxu1  ;;  %v1001_v41 = vpop.f32.mrb[7].mxu0 }
 0x11a   :  { %v677_v42 = vadd.f32 %v999_v36, %v637_v32  ;;  %v1023_v43 = vpop.f32.mrb[7].mxu1 }
 0x11c   :  { %v717_v44 = vadd.f32 %v1021_v39, %v677_v42 }
 0x11e   :  { %v722_v45 = vmax.f32 %v717_v44, 0.0 }
 0x120   :  { %v728_v46 = vpack.c.bf16 %v722_v45, %v722_v45 }
 0x122   :  { %1036 = vmatmul.mubr.msk.bf16.vlgmr.msra.gmra.mrb[8].mxu0 %vm747_vm1, %v728_v46 }
 0x1f5   :  { %v785_v49 = vpop.f32.mrb[8].mxu0 }
 0x1f6   :  { %v786_v50 = vadd.f32 %v929_v48, %v785_v49  ;;  %v1037_v51 = vpop.f32.mrb[9].mxu0 }
 0x1f7   :  { %v788_v52 = vpop.f32.mrb[10].mxu0 }
 0x1f8   :  { %v791_v53 = vmax.f32 %v786_v50, 0.0  ;;  %v1038_v54 = vpop.f32.mrb[11].mxu0 }
 0x1fa   :  { %v797_v55 = vpack.c.bf16 %v791_v53, %v791_v53 }
 0x1fc   :  { %1044 = vmatmul.mubr.msk.bf16.vlgmr.msra.gmra.mrb[8].mxu1 %vm747_vm1, %v797_v55 }
 0x2cf   :  { %v853_v57 = vpop.f32.mrb[8].mxu1 }
 0x2d0   :  { %v854_v58 = vadd.f32 %v933_v56, %v853_v57  ;;  %v1045_v59 = vpop.f32.mrb[9].mxu1 }
 0x2d1   :  { %v856_v60 = vpop.f32.mrb[10].mxu1 }
 0x2d2   :  { %859 = vst [vmem:[%s1406_s7] sm:$0xff] %v854_v58  ;;  %v1046_v61 = vpop.f32.mrb[11].mxu1 }

</bundles_post_ra>
